<compile_context>
chip_gen: v6e
topology: v6e:2x2x1
jax: 0.10.0
libtpu: 0.0.40
codegen_flags: <defaults>
</compile_context>

<pallas_src>
import functools

import jax
import jax.numpy as jnp
from jax.experimental import pallas as pl
from jax.experimental.pallas import tpu as pltpu

DEFAULT_BETA = 100.0


# --------------------------------------------------------------------------- helpers
def _round_up(x, m):
    return ((x + m - 1) // m) * m


def _itemsize(dt):
    return jnp.dtype(dt).itemsize


def _sublane(dtype):
    b = _itemsize(dtype)
    if b >= 4:
        return 8
    if b == 2:
        return 16
    return 32


def _vmem_budget_bytes():
    """Per-TensorCore VMEM budget with headroom. Conservative fallback = v7x (64 MiB)."""
    cap = 64 * 1024 * 1024
    try:
        info = pltpu.get_tpu_info()
        v = int(getattr(info, "vmem_capacity_bytes", 0) or 0)
        if v >= 16 * 1024 * 1024:
            cap = v
    except Exception:
        pass
    return max(cap - 8 * 1024 * 1024, 24 * 1024 * 1024)


def _largest_divisor_tile(dim, cap=1024):
    """Largest multiple of 128 that divides `dim` (dim is a multiple of 128), <= cap."""
    best = 128
    t = 128
    lim = min(dim, cap)
    while t <= lim:
        if dim % t == 0:
            best = t
        t += 128
    return best


def _apply_act(y, activation_type, beta):
    if activation_type == "relu":
        return jnp.maximum(y, 0.0)
    # swish: y * sigmoid(beta * y)   (sigmoid -> EUP; free slot next to the VPU)
    return y * jax.nn.sigmoid(beta * y)


def _pad_and_cast(x, m_pad, d_pad, mxu_dtype):
    M, D = x.shape
    if (m_pad, d_pad) != (M, D):
        x_res = jnp.zeros((m_pad, d_pad), x.dtype).at[:M, :D].set(x)
    else:
        x_res = x
    x_mm = x_res if x_res.dtype == jnp.dtype(mxu_dtype) else x_res.astype(mxu_dtype)
    return x_res, x_mm


def prepare_weight(weight, mxu_dtype=jnp.bfloat16):
    """One-time weight preparation (do once at parameter setup, reuse across calls):
    transpose PyTorch (out, in) -> (in, out) so the kernel contracts dim 0 of the weight
    (no per-step XLU transpose), zero-pad to a multiple of 128 lanes, and cast to the
    MXU operand dtype."""
    d_out, d_in = weight.shape
    assert d_out == d_in, "BasicResidualBlock uses a square weight"
    d_pad = _round_up(max(d_in, 128), 128)
    w = weight.T.astype(mxu_dtype)
    if d_pad != d_in:
        w = jnp.zeros((d_pad, d_pad), mxu_dtype).at[:d_in, :d_in].set(w)
    return w


# --------------------------------------------------------------------------- kernels
def _resident_weight_kernel(x_mm_ref, w_ref, xres_ref, o_ref, *, activation_type, beta):
    """Whole (padded) weight resident in VMEM; one MXU pass per (block_m, d_pad) row
    tile, residual add + activation fused, no accumulator scratch."""
    y = jnp.dot(x_mm_ref[...], w_ref[...], preferred_element_type=jnp.float32)
    y = y + xres_ref[...].astype(jnp.float32)
    o_ref[...] = _apply_act(y, activation_type, beta).astype(o_ref.dtype)


def _tiled_mnk_kernel(x_mm_ref, w_ref, xres_ref, o_ref, acc_ref, *, activation_type, beta):
    """M/N/K-tiled fallback for weights that do not fit in VMEM; k (contraction) is the
    innermost grid axis, output tile resident across it."""
    k = pl.program_id(2)

    @pl.when(k == 0)
    def _():
        # Initialize the accumulator with the residual: removes the zero-fill and the
        # epilogue add (the residual tile is already resident — its block index is (i, j)).
        acc_ref[...] = xres_ref[...].astype(jnp.float32)

    acc_ref[...] += jnp.dot(x_mm_ref[...], w_ref[...], preferred_element_type=jnp.float32)

    @pl.when(k == pl.num_programs(2) - 1)
    def _():
        o_ref[...] = _apply_act(acc_ref[...], activation_type, beta).astype(o_ref.dtype)


# --------------------------------------------------------------------------- wrapper
def basic_residual_block(x, weight, *, activation_type="relu", beta=DEFAULT_BETA,
                         mxu_dtype=jnp.bfloat16, weight_is_prepared=False,
                         block_m=None, block_n=None, block_k=None,
                         force_tiled=False, vmem_budget_bytes=None):
    """Fused BasicResidualBlock forward: act(x @ W^T + x).

    x:      (M, D) activations.
    weight: raw PyTorch nn.Linear weight (D, D) in (out, in) layout, or a weight
            prepared once via prepare_weight() (pass weight_is_prepared=True) to avoid
            a per-call D^2 pad/transpose/cast HBM round trip.
    mxu_dtype: matmul operand dtype (default bf16, native MXU path; accumulation,
               residual add and activation stay f32). Use jnp.float32 for exact math.
    """
    activation_type = activation_type.lower()
    if activation_type not in ("relu", "swish"):
        raise NotImplementedError(activation_type)

    M, D = x.shape
    d_pad = _round_up(max(D, 128), 128)
    if mxu_dtype is None:
        mxu_dtype = x.dtype

    if weight_is_prepared:
        assert weight.shape == (d_pad, d_pad), (weight.shape, d_pad)
        w_p = weight if weight.dtype == jnp.dtype(mxu_dtype) else weight.astype(mxu_dtype)
    else:
        assert weight.shape == (D, D)
        w_p = prepare_weight(weight, mxu_dtype=mxu_dtype)

    mxu_b = _itemsize(mxu_dtype)
    x_b = _itemsize(x.dtype)
    out_b = x_b
    sub = max(_sublane(mxu_dtype), _sublane(x.dtype))

    budget = int(vmem_budget_bytes) if vmem_budget_bytes is not None else _vmem_budget_bytes()
    kern_kwargs = dict(activation_type=activation_type, beta=beta)

    # ---- path selection: keep W resident in VMEM whenever it fits -----------------
    w_resident_bytes = 2 * d_pad * d_pad * mxu_b           # conservatively double-buffered
    per_row_bytes = 2 * d_pad * (mxu_b + x_b + out_b)      # x_mm + residual + out (dbl-buf)
    resident_fits = (w_resident_bytes + sub * per_row_bytes) <= budget
    use_tiled = force_tiled or (block_n is not None) or (block_k is not None) or not resident_fits

    if not use_tiled:
        # -------- Path A: weight resident, k axis collapsed, no accumulator --------
        if block_m is None:
            max_bm = (budget - w_resident_bytes) // per_row_bytes
            cap = min(int(max_bm), 1024)
            cap -= cap % sub
            m_aligned = _round_up(M, sub)
            if m_aligned <= cap:
                block_m = m_aligned
            else:
                cands = list(range(128, cap + 1, 128)) or [cap]
                # minimize M-padding waste, prefer larger tiles on ties
                block_m = min(cands, key=lambda bm: (_round_up(M, bm) - M, -bm))
        block_m = _round_up(block_m, sub)
        m_pad = _round_up(M, block_m)

        x_res, x_mm = _pad_and_cast(x, m_pad, d_pad, mxu_dtype)

        cost = pl.CostEstimate(
            flops=2 * m_pad * d_pad * d_pad,
            transcendentals=(m_pad * d_pad if activation_type == "swish" else 0),
            bytes_accessed=(m_pad * d_pad * (mxu_b + x_b + out_b)   # x (mm) + residual + out
                            + d_pad * d_pad * mxu_b),               # W streamed once
        )
        out_p = pl.pallas_call(
            functools.partial(_resident_weight_kernel, **kern_kwargs),
            out_shape=jax.ShapeDtypeStruct((m_pad, d_pad), x.dtype),
            grid_spec=pltpu.PrefetchScalarGridSpec(
                num_scalar_prefetch=0,
                grid=(m_pad // block_m,),
                in_specs=[
                    pl.BlockSpec((block_m, d_pad), lambda i: (i, 0)),  # x (matmul operand)
                    pl.BlockSpec((d_pad, d_pad), lambda i: (0, 0)),    # W resident, fetched once
                    pl.BlockSpec((block_m, d_pad), lambda i: (i, 0)),  # x (residual)
                ],
                out_specs=pl.BlockSpec((block_m, d_pad), lambda i: (i, 0)),
            ),
            compiler_params=pltpu.CompilerParams(
                dimension_semantics=("parallel",),
                vmem_limit_bytes=budget,
            ),
            cost_estimate=cost,
        )(x_mm, w_p, x_res)
    else:
        # -------- Path B: M/N/K tiling with f32 accumulator (large D) --------------
        if block_n is None:
            block_n = _largest_divisor_tile(d_pad, cap=1024)
        if block_k is None:
            block_k = _largest_divisor_tile(d_pad, cap=1024)
        assert d_pad % block_n == 0 and d_pad % block_k == 0

        def _vmem_need(bm):
            return (2 * bm * block_k * mxu_b          # x_mm tiles (dbl-buf)
                    + 2 * block_k * block_n * mxu_b   # W tiles
                    + 2 * bm * block_n * x_b          # residual tiles
                    + 2 * bm * block_n * out_b        # output tiles
                    + bm * block_n * 4)               # f32 accumulator

        if block_m is None:
            n_restream = d_pad // block_n
            cands = [bm for bm in range(128, 2048 + 1, 128) if _vmem_need(bm) <= budget]
            m_small = _round_up(M, sub)
            if m_small < 128 and _vmem_need(m_small) <= budget:
                cands.append(m_small)
            if not cands:
                cands = [sub]

            def _hbm_traffic(bm):
                mp = _round_up(M, bm)
                return (mp * d_pad * (mxu_b * n_restream + x_b + out_b)
                        + (mp // bm) * d_pad * d_pad * mxu_b)

            block_m = min(cands, key=lambda bm: (_hbm_traffic(bm), -bm))
        block_m = _round_up(block_m, sub)
        m_pad = _round_up(M, block_m)

        x_res, x_mm = _pad_and_cast(x, m_pad, d_pad, mxu_dtype)

        cost = pl.CostEstimate(
            flops=2 * m_pad * d_pad * d_pad,
            transcendentals=(m_pad * d_pad if activation_type == "swish" else 0),
            bytes_accessed=(m_pad * d_pad * mxu_b * (d_pad // block_n)        # x restreamed per j
                            + m_pad * d_pad * (x_b + out_b)                    # residual + out
                            + (m_pad // block_m) * d_pad * d_pad * mxu_b),     # W restreamed per i
        )
        out_p = pl.pallas_call(
            functools.partial(_tiled_mnk_kernel, **kern_kwargs),
            out_shape=jax.ShapeDtypeStruct((m_pad, d_pad), x.dtype),
            grid_spec=pltpu.PrefetchScalarGridSpec(
                num_scalar_prefetch=0,
                grid=(m_pad // block_m, d_pad // block_n, d_pad // block_k),
                in_specs=[
                    pl.BlockSpec((block_m, block_k), lambda i, j, k: (i, k)),  # x (matmul)
                    pl.BlockSpec((block_k, block_n), lambda i, j, k: (k, j)),  # W (in, out) layout
                    pl.BlockSpec((block_m, block_n), lambda i, j, k: (i, j)),  # x (residual)
                ],
                out_specs=pl.BlockSpec((block_m, block_n), lambda i, j, k: (i, j)),
                scratch_shapes=[pltpu.VMEM((block_m, block_n), jnp.float32)],
            ),
            compiler_params=pltpu.CompilerParams(
                dimension_semantics=("parallel", "parallel", "arbitrary"),
                vmem_limit_bytes=budget,
            ),
            cost_estimate=cost,
        )(x_mm, w_p, x_res)

    if (m_pad, d_pad) != (M, D):
        out_p = out_p[:M, :D]
    return out_p


# --------------------------------------------------------------------------- reference
def _reference(x, weight, activation_type="relu", beta=DEFAULT_BETA):
    y = x @ weight.T + x
    if activation_type == "relu":
        return jnp.maximum(y, 0.0)
    return y * jax.nn.sigmoid(beta * y)


if __name__ == "__main__":
    key = jax.random.PRNGKey(0)
    k_x, k_w, k_x2, k_w2 = jax.random.split(key, 4)

    # Toy shape matching the module (in_dim=32 is padded to 128 lanes internally).
    batch, in_dim = 8, 32
    x = jax.random.normal(k_x, (batch, in_dim), dtype=jnp.float32)
    bound = 1.0 / jnp.sqrt(in_dim)
    w = jax.random.uniform(k_w, (in_dim, in_dim), minval=-bound, maxval=bound,
                           dtype=jnp.float32)

    # Exact f32 operand path (matches the module's numerics tightly).
    out_relu = jax.block_until_ready(
        basic_residual_block(x, w, activation_type="relu", mxu_dtype=jnp.float32))
    assert jnp.allclose(out_relu, _reference(x, w, "relu"), atol=1e-5, rtol=1e-5)

    out_swish = jax.block_until_ready(
        basic_residual_block(x, w, activation_type="swish", mxu_dtype=jnp.float32))
    assert jnp.allclose(out_swish, _reference(x, w, "swish"), atol=1e-5, rtol=1e-5)

    # Default bf16 MXU-operand path (f32 accumulation / residual / activation).
    out_bf16 = jax.block_until_ready(
        basic_residual_block(x, w, activation_type="relu"))
    assert jnp.allclose(out_bf16, _reference(x, w, "relu"), atol=5e-2, rtol=5e-2)

    # Slightly larger shape: one-time prepared weight + resident-weight fast path.
    batch2, dim2 = 16, 256
    x2 = jax.random.normal(k_x2, (batch2, dim2), dtype=jnp.float32)
    bound2 = 1.0 / jnp.sqrt(dim2)
    w2 = jax.random.uniform(k_w2, (dim2, dim2), minval=-bound2, maxval=bound2,
                            dtype=jnp.float32)
    w2_prep = prepare_weight(w2, mxu_dtype=jnp.bfloat16)   # pad/transpose/cast once
    out_prep = jax.block_until_ready(
        basic_residual_block(x2, w2_prep, activation_type="swish",
                             weight_is_prepared=True))
    assert jnp.allclose(out_prep, _reference(x2, w2, "swish"), atol=5e-2, rtol=5e-2)

    # Force the tiled M/N/K fallback (accumulator + residual-init path), exact f32.
    out_tiled = jax.block_until_ready(
        basic_residual_block(x2, w2, activation_type="relu", mxu_dtype=jnp.float32,
                             force_tiled=True, block_m=8, block_n=128, block_k=128))
    assert jnp.allclose(out_tiled, _reference(x2, w2, "relu"), atol=1e-5, rtol=1e-5)

    print("KERNEL_OK")
</pallas_src>

<mosaic_0001>
module attributes {stable_mosaic.version = 11 : i64} {
  func.func @_resident_weight_kernel(%arg0: i32, %arg1: memref<8x128xf32, #tpu.memory_space<vmem>>, %arg2: memref<128x128xf32, #tpu.memory_space<vmem>>, %arg3: memref<8x128xf32, #tpu.memory_space<vmem>>, %arg4: memref<8x128xf32, #tpu.memory_space<vmem>>) attributes {dimension_semantics = [#tpu.dimension_semantics<parallel>], iteration_bounds = array<i64: 1>, scalar_prefetch = 0 : i64, scratch_operands = 0 : i64, tpu.core_type = #tpu.core_type<tc>, window_params = [{transform_indices = @transform_0, window_bounds = array<i64: 8, 128>}, {pipeline_mode = #tpu.pipeline_mode<synchronous>, transform_indices = @transform_1, window_bounds = array<i64: 128, 128>}, {transform_indices = @transform_2, window_bounds = array<i64: 8, 128>}, {transform_indices = @transform_3, window_bounds = array<i64: 8, 128>}]} {
    %c0 = arith.constant 0 : index
    %c0_0 = arith.constant 0 : index
    %0 = vector.load %arg1[%c0, %c0_0] : memref<8x128xf32, #tpu.memory_space<vmem>>, vector<8x128xf32>
    %c0_1 = arith.constant 0 : index
    %c0_2 = arith.constant 0 : index
    %1 = vector.load %arg2[%c0_1, %c0_2] : memref<128x128xf32, #tpu.memory_space<vmem>>, vector<128x128xf32>
    %cst = arith.constant dense<0.000000e+00> : vector<8x128xf32>
    %2 = tpu.matmul %0, %1, %cst {dimension_numbers = #tpu.dot_dimension_numbers<[1], [0], [0], [1], [0, 0, 1, 1], [], []>} : vector<8x128xf32>, vector<128x128xf32>, vector<8x128xf32> -> vector<8x128xf32>
    %c0_3 = arith.constant 0 : index
    %c0_4 = arith.constant 0 : index
    %3 = vector.load %arg3[%c0_3, %c0_4] : memref<8x128xf32, #tpu.memory_space<vmem>>, vector<8x128xf32>
    %4 = arith.addf %2, %3 : vector<8x128xf32>
    %cst_5 = arith.constant 0.000000e+00 : f32
    %5 = vector.broadcast %cst_5 : f32 to vector<8x128xf32>
    %6 = arith.maximumf %4, %5 : vector<8x128xf32>
    %c0_6 = arith.constant 0 : index
    %c0_7 = arith.constant 0 : index
    %7 = vector.load %arg4[%c0_6, %c0_7] : memref<8x128xf32, #tpu.memory_space<vmem>>, vector<8x128xf32>
    tpu.vector_store %arg4[%c0_6, %c0_7], %6 {strides = array<i32>} : memref<8x128xf32, #tpu.memory_space<vmem>>, vector<8x128xf32>,
    return
  }
  func.func @transform_0(%arg0: i32) -> (i32, i32) {
    %c0_i32 = arith.constant 0 : i32
    %c0_i32_0 = arith.constant 0 : i32
    return %arg0, %c0_i32 : i32, i32
  }
  func.func @transform_1(%arg0: i32) -> (i32, i32) {
    %c0_i32 = arith.constant 0 : i32
    %c0_i32_0 = arith.constant 0 : i32
    %c0_i32_1 = arith.constant 0 : i32
    return %c0_i32, %c0_i32_0 : i32, i32
  }
  func.func @transform_2(%arg0: i32) -> (i32, i32) {
    %c0_i32 = arith.constant 0 : i32
    %c0_i32_0 = arith.constant 0 : i32
    return %arg0, %c0_i32 : i32, i32
  }
  func.func @transform_3(%arg0: i32) -> (i32, i32) {
    %c0_i32 = arith.constant 0 : i32
    %c0_i32_0 = arith.constant 0 : i32
    return %arg0, %c0_i32 : i32, i32
  }
}

</mosaic_0001>

<bundles_post_ra>
// kernel: tpu_custom_call.1
= control target key start
LH: loop header
LB: loop body
LE: loop exit
PB: predicated region body
PF: predicated region fallthrough
CT: control target
= control target key end

     0   :  { %8 = vsyncpa [#allocation3], 0  ;;  %s344_s0 = inlined_call_operand.hbm [shape: f32[8,128], index: 0, kind: input, shape index: {}]   ;;  %s345_s1 = inlined_call_operand.hbm [shape: f32[128,128], index: 1, kind: input, shape index: {}]   ;;  %s346_s2 = inlined_call_operand.hbm [shape: f32[8,128], index: 2, kind: input, shape index: {}]   ;;  %s347_s3 = inlined_call_operand.hbm [shape: f32[8,128], index: 3, kind: output, shape index: {}]  }
   0x1   :  { %9 = vsyncpa [#allocation6], 0 }
   0x2   :  { %10 = vsyncpa [#allocation4], 0  ;;  %s304_s12 = smov [#allocation5]  }
   0x3   :  { %s26_s13 = sshll.u32 %s304_s12, 4  ;;  %s27_s13 = int_to_ptr.vmem [resolvable:$true] %s26_s13 }
   0x4   :  { %s226_s14 = scalar_lea.vmem %s27_s13, 2048  ;;  %p231_p1 = scmp.lt.s32.totalorder %s27_s13, %s27_s13 }
   0x5   :  { %p227_p0 = scmp.ne.s32.totalorder %s27_s13, %s226_s14  ;;  %p232_p2 = scmp.lt.s32.totalorder %s226_s14, %s226_s14 }
   0x7   :  { %p233_p3 = por %p232_p2, %p231_p1 }
   0x9   :  { %p234_p4 = pnand %p233_p3, %p227_p0 }
   0xb   :  { %237 = shalt.err (!%p234_p4)
}
   0xc   :  { %s305_s15 = smov 128   ;;  %s306_s16 = smov 8  }
   0xd   :  { %32 = dma.hbm_to_vmem [thread:$0]  %s345_s1, 2048, %s27_s13, [#allocation6], %s305_s15, %s305_s15, %s306_s16  }
   0xe   :  { %s307_s19 = smov [#allocation2]   ;;  %s308_s21 = smov [#allocation7]  }
   0xf   :  { %s17_s20 = sshll.u32 %s307_s19, 4  ;;  %s39_s22 = sshll.u32 %s308_s21, 4  ;;  %s18_s20 = int_to_ptr.vmem [resolvable:$true] %s17_s20  ;;  %s40_s22 = int_to_ptr.vmem [resolvable:$true] %s39_s22 }
  0x10   :  { %s246_s23 = scalar_lea.vmem %s18_s20, 128  ;;  %p251_p6 = scmp.lt.s32.totalorder %s18_s20, %s18_s20 }
  0x11   :  { %p247_p5 = scmp.ne.s32.totalorder %s18_s20, %s246_s23  ;;  %p252_p7 = scmp.lt.s32.totalorder %s246_s23, %s246_s23 }
  0x13   :  { %p253_p8 = por %p252_p7, %p251_p6 }
  0x15   :  { %p254_p9 = pnand %p253_p8, %p247_p5 }
  0x17   :  { %257 = shalt.err (!%p254_p9)
}
  0x18   :  { %20 = dma.hbm_to_vmem [thread:$0]  %s344_s0, 128, %s18_s20, [#allocation3]  }
  0x19   :  { %s266_s26 = scalar_lea.vmem %s40_s22, 128  ;;  %p271_p11 = scmp.lt.s32.totalorder %s40_s22, %s40_s22 }
  0x1a   :  { %p267_p10 = scmp.ne.s32.totalorder %s40_s22, %s266_s26  ;;  %p272_p12 = scmp.lt.s32.totalorder %s266_s26, %s266_s26 }
  0x1c   :  { %p273_p13 = por %p272_p12, %p271_p11 }
  0x1e   :  { %p274_p0 = pnand %p273_p13, %p267_p10 }
  0x20   :  { %277 = shalt.err (!%p274_p0)
}
  0x21   :  { %42 = dma.hbm_to_vmem [thread:$0]  %s346_s2, 128, %s40_s22, [#allocation6]  }
  0x22   :  { %298 = dma.done.wait [#allocation3], 128  }
  0x23   :  { %299 = vsyncadd [#allocation3], 4294967168 }
  0x24   :  { %300 = dma.done.wait [#allocation6], 2176  }
  0x25   :  { %301 = vsyncadd [#allocation6], 4294965120  ;;  %v309_v0 = vmov 0.0   ;;  %vm310_vm0 = vmmov 0   ;;  %v68_v1 = vld [vmem:[#allocation5 + $0x78] sm:$0xff]  ;;  %v67_v2 = vld [vmem:[#allocation5 + $0x70] sm:$0xff] }
  0x26   :  { %175 = vmatprep.subr.mxu0 %v309_v0  ;;  %207 = vmatprep.mubr.msk.f32.mxu0 %vm310_vm0, %v309_v0  ;;  %v66_v3 = vld [vmem:[#allocation5 + $0x68] sm:$0xff]  ;;  %v65_v4 = vld [vmem:[#allocation5 + $0x60] sm:$0xff]  ;;  %v64_v5 = vld [vmem:[#allocation5 + $0x58] sm:$0xff]  ;;  %s311_s0 = smov [#allocation8]  }
  0x27   :  { %176 = vmatpush3.msra.mxu0 %v68_v1  ;;  %v63_v6 = vld [vmem:[#allocation5 + $0x50] sm:$0xff]  ;;  %v62_v7 = vld [vmem:[#allocation5 + $0x48] sm:$0xff]  ;;  %v61_v8 = vld [vmem:[#allocation5 + $0x40] sm:$0xff]  ;;  %s148_s2 = sshll.u32 %s311_s0, 4  ;;  %s149_s2 = int_to_ptr.vmem [resolvable:$true] %s148_s2 }
  0x28   :  { %177 = vmatprep.subr.mxu0 %v309_v0  ;;  %v60_v9 = vld [vmem:[#allocation5 + $0x38] sm:$0xff]  ;;  %v59_v10 = vld [vmem:[#allocation5 + $0x30] sm:$0xff]  ;;  %v58_v11 = vld [vmem:[#allocation5 + $0x28] sm:$0xff]  ;;  %s278_s28 = scalar_lea.vmem %s149_s2, 128  ;;  %p283_p2 = scmp.lt.s32.totalorder %s149_s2, %s149_s2 }
  0x29   :  { %178 = vmatpush3.msra.mxu0 %v67_v2  ;;  %v57_v12 = vld [vmem:[#allocation5 + $0x20] sm:$0xff]  ;;  %v56_v13 = vld [vmem:[#allocation5 + $0x18] sm:$0xff]  ;;  %v55_v14 = vld [vmem:[#allocation5 + $0x10] sm:$0xff]  ;;  %p279_p1 = scmp.ne.s32.totalorder %s149_s2, %s278_s28  ;;  %p284_p3 = scmp.lt.s32.totalorder %s278_s28, %s278_s28 }
  0x2a   :  { %179 = vmatprep.subr.mxu0 %v309_v0  ;;  %v54_v15 = vld [vmem:[#allocation5 + $0x8] sm:$0xff]  ;;  %v53_v16 = vld [vmem:[#allocation5] sm:$0xff]  ;;  %v52_v17 = vld [vmem:[#allocation2] sm:$0xff] }
  0x2b   :  { %180 = vmatpush3.msra.mxu0 %v66_v3  ;;  %v69_v18 = vld [vmem:[#allocation7] sm:$0xff]  ;;  %p285_p4 = por %p284_p3, %p283_p2 }
  0x2c   :  { %181 = vmatprep.subr.mxu0 %v309_v0 }
  0x2d   :  { %182 = vmatpush3.msra.mxu0 %v65_v4  ;;  %p286_p5 = pnand %p285_p4, %p279_p1 }
  0x2e   :  { %183 = vmatprep.subr.mxu0 %v309_v0 }
  0x2f   :  { %184 = vmatpush3.msra.mxu0 %v64_v5 }
  0x30   :  { %185 = vmatprep.subr.mxu0 %v309_v0 }
  0x31   :  { %186 = vmatpush3.msra.mxu0 %v63_v6 }
  0x32   :  { %187 = vmatprep.subr.mxu0 %v309_v0 }
  0x33   :  { %188 = vmatpush3.msra.mxu0 %v62_v7 }
  0x34   :  { %189 = vmatprep.subr.mxu0 %v309_v0 }
  0x35   :  { %190 = vmatpush3.msra.mxu0 %v61_v8 }
  0x36   :  { %191 = vmatprep.subr.mxu0 %v309_v0 }
  0x37   :  { %192 = vmatpush3.msra.mxu0 %v60_v9 }
  0x38   :  { %193 = vmatprep.subr.mxu0 %v309_v0 }
  0x39   :  { %194 = vmatpush3.msra.mxu0 %v59_v10 }
  0x3a   :  { %195 = vmatprep.subr.mxu0 %v309_v0 }
  0x3b   :  { %196 = vmatpush3.msra.mxu0 %v58_v11 }
  0x3c   :  { %197 = vmatprep.subr.mxu0 %v309_v0 }
  0x3d   :  { %198 = vmatpush3.msra.mxu0 %v57_v12 }
  0x3e   :  { %199 = vmatprep.subr.mxu0 %v309_v0 }
  0x3f   :  { %200 = vmatpush3.msra.mxu0 %v56_v13 }
  0x40   :  { %201 = vmatprep.subr.mxu0 %v309_v0 }
  0x41   :  { %202 = vmatpush3.msra.mxu0 %v55_v14 }
  0x42   :  { %203 = vmatprep.subr.mxu0 %v309_v0 }
  0x43   :  { %204 = vmatpush3.msra.mxu0 %v54_v15 }
  0x44   :  { %205 = vmatprep.subr.mxu0 %v309_v0 }
  0x45   :  { %206 = vmatpush3.msra.mxu0 %v53_v16 }
  0x46   :  { %208 = vmatmul.mubr.f32.vlgmr.msra.gmra.mxu0 %v52_v17 }
 0x106   :  { %v136_v19 = vpop.f32.mrf.mxu0 }
 0x107   :  { %v137_v20 = vadd.f32 %v136_v19, %v69_v18 }
 0x108   :  { %v209_v21 = vpop.f32.mrf.mxu0 }
 0x109   :  { %v140_v22 = vmax.f32 %v137_v20, 0.0 }
 0x10b   :  { %141 = vst [vmem:[#allocation8] sm:$0xff] %v140_v22 }
 0x10c   :  { %289 = shalt.err (!%p286_p5)
}
 0x10d   :  { %151 = dma.vmem_to_hbm [thread:$0]  %s149_s2, 128, %s347_s3, [#allocation4]  }
 0x10e   :  { %302 = dma.done.wait [#allocation4], 128  }
 0x10f   :  { %303 = vsyncadd [#allocation4], 4294967168 }
 0x110   :  { %155 = vsyncpa [#allocation3], 1 }
 0x111   :  { %156 = vsyncpa [#allocation6], 1 }
 0x112   :  { %157 = vsyncpa [#allocation4], 1 }

</bundles_post_ra>
